<compile_context>
chip_gen: v6e
topology: v6e:2x2x1
jax: 0.10.0
libtpu: 0.0.40
codegen_flags: <defaults>
</compile_context>

<pallas_src>
import jax
import jax.numpy as jnp
from jax.experimental import pallas as pl
from jax.experimental.pallas import tpu as pltpu


def _round_up(x, m):
    return ((x + m - 1) // m) * m


def _make_kernel(head_offsets, head_sizes):
    """One fused bf16 matmul per tile, per-head lane-dense output writes."""

    def kernel(x_ref, w_ref, b_ref, *o_refs):
        # x_ref: (1, C_in, TP)         one image (or folded batch), one tile
        # w_ref: (C_out_pad, C_in)     all heads' weights fused, bf16
        # b_ref: (C_out_pad, 1)        fused biases, f32
        # o_refs[j]: (1, c_out_j, TP)  per-head lane-dense output tile
        x = x_ref[0].astype(jnp.bfloat16)                        # (C_in, TP)
        y = jnp.dot(w_ref[...], x,
                    preferred_element_type=jnp.float32)          # (C_out_pad, TP)
        y = y + b_ref[...]
        for o_ref, off, c in zip(o_refs, head_offsets, head_sizes):
            # off is a multiple of 8 (sublane aligned) by construction.
            o_ref[0] = y[off:off + c].astype(o_ref.dtype)

    return kernel


def fused_conv1x1_pallas(x_nchw, w_fused_bf16, b_fused, head_offsets,
                         head_sizes, *, tp_max=1024):
    """All 1x1-conv heads as one lane-dense, bf16-MXU Pallas matmul.

    x_nchw:        (N, C_in, H, W) f32
    w_fused_bf16:  (C_out_pad, C_in) bf16, heads concatenated along axis 0 with
                   each head's rows zero-padded to a multiple of 8
    b_fused:       (C_out_pad,) f32
    returns: list of (N, c_out_j, H, W) arrays, one per head
    """
    assert tp_max % 128 == 0, "tp_max must be a multiple of 128"
    N, C_in, H, W = x_nchw.shape
    hw = H * W
    C_out_pad = w_fused_bf16.shape[0]
    out_dtype = x_nchw.dtype
    itemsize = jnp.dtype(out_dtype).itemsize

    # Deep SSD extras layers have tiny feature maps: fold the batch into the
    # lane dimension so a single un-padded grid step covers all images.  The
    # transpose is negligible for these tiny tensors.
    folded = (hw < 128) and (N > 1)
    if folded:
        x3 = jnp.transpose(x_nchw.reshape(N, C_in, hw), (1, 0, 2))
        x3 = x3.reshape(1, C_in, N * hw)
        n_img, lanes = 1, N * hw
    else:
        x3 = x_nchw.reshape(N, C_in, hw)
        n_img, lanes = N, hw

    # Spatial tile: a multiple of 128 lanes (or the exact width when < 128),
    # capped at tp_max, and chosen so there are >= 2 spatial tiles whenever
    # possible (v7x megacore split lands on the leading spatial grid axis).
    if lanes <= 128:
        tp = lanes
    else:
        tp = min(tp_max, _round_up(pl.cdiv(lanes, 2), 128))
    n_tiles = pl.cdiv(lanes, tp)

    b2 = b_fused.reshape(C_out_pad, 1)
    kernel = _make_kernel(tuple(head_offsets), tuple(head_sizes))

    out_shape = tuple(
        jax.ShapeDtypeStruct((n_img, c, lanes), out_dtype) for c in head_sizes)
    out_specs = tuple(
        pl.BlockSpec((1, c, tp), lambda s, n: (n, 0, s)) for c in head_sizes)

    # Advisory cost so XLA can schedule/overlap around this mem-bound call.
    flops = 2 * n_img * lanes * C_in * sum(head_sizes)
    bytes_accessed = (n_img * C_in * lanes * itemsize               # X
                      + C_out_pad * C_in * 2                        # W (bf16)
                      + n_img * sum(head_sizes) * lanes * itemsize)  # Y
    cost = pl.CostEstimate(flops=int(flops), transcendentals=0,
                           bytes_accessed=int(bytes_accessed))

    # VMEM budget: double-buffered X and per-head Y blocks + resident W/bias
    # (bias block is lane-padded to 128 in VMEM).  Clamp to [32, 64] MiB so
    # the raised tile size compiles on every generation including v7x.
    est = (2 * C_in * tp * itemsize
           + 2 * sum(head_sizes) * tp * itemsize
           + 2 * C_out_pad * C_in * 2
           + 2 * C_out_pad * 128 * 4)
    vmem_limit = int(min(64 * 1024 * 1024, max(32 * 1024 * 1024, 2 * est)))

    outs = pl.pallas_call(
        kernel,
        out_shape=out_shape,
        grid_spec=pltpu.PrefetchScalarGridSpec(
            num_scalar_prefetch=0,
            grid=(n_tiles, n_img),            # spatial axis first (megacore)
            in_specs=[
                pl.BlockSpec((1, C_in, tp), lambda s, n: (n, 0, s)),
                # Constant index_map -> fetched once, resident across the grid.
                pl.BlockSpec((C_out_pad, C_in), lambda s, n: (0, 0)),
                pl.BlockSpec((C_out_pad, 1), lambda s, n: (0, 0)),
            ],
            out_specs=out_specs,
        ),
        compiler_params=pltpu.CompilerParams(
            dimension_semantics=("parallel", "parallel"),
            vmem_limit_bytes=vmem_limit),
        cost_estimate=cost,
    )(x3, w_fused_bf16, b2)

    results = []
    for y, c in zip(outs, head_sizes):
        if folded:
            # (1, c, N*hw) -> (c, N, hw) -> (N, c, hw): tiny tensors, cheap.
            y = jnp.transpose(y.reshape(c, N, hw), (1, 0, 2))
        results.append(y.reshape(N, c, H, W))
    return results


class WeaveBlockPallas:
    """JAX/Pallas re-implementation of the PyTorch 1x1-conv weave block."""

    def __init__(self, raw_channel, weave_add_channel, dense_num, key):
        assert dense_num <= len(weave_add_channel)
        self.raw_channel = raw_channel
        self.out_channels = [int(weave_add_channel[j]) for j in range(dense_num)]
        self.weights = []   # f32 master weights, (c_out, c_in) per head
        self.biases = []
        for c_out in self.out_channels:
            key, sub = jax.random.split(key)
            # kaiming_normal, mode='fan_out', 1x1 kernel: std = sqrt(2 / c_out)
            std = (2.0 / c_out) ** 0.5
            w = std * jax.random.normal(sub, (c_out, raw_channel), jnp.float32)
            b = jnp.zeros((c_out,), jnp.float32)     # bias initialized to 0
            self.weights.append(w)
            self.biases.append(b)

        # Fuse all heads (X is read from HBM once for every head).  Each head's
        # rows are zero-padded to a multiple of 8 so its offset inside the
        # fused result is sublane aligned.  Weights are stored in bf16 for the
        # single-pass MXU path; biases stay f32 (added after the f32 accumulate).
        w_parts, b_parts, offsets = [], [], []
        off = 0
        for w, b in zip(self.weights, self.biases):
            c_out = w.shape[0]
            c_pad = _round_up(c_out, 8)
            offsets.append(off)
            w_parts.append(jnp.pad(w, ((0, c_pad - c_out), (0, 0))))
            b_parts.append(jnp.pad(b, (0, c_pad - c_out)))
            off += c_pad
        self.head_offsets = offsets
        self.w_fused = jnp.concatenate(w_parts, axis=0).astype(jnp.bfloat16)
        self.b_fused = jnp.concatenate(b_parts, axis=0)      # f32

    def __call__(self, x):
        # x: (N, C, H, W) -- NCHW like PyTorch; no layout transposes needed.
        N, C, H, W = x.shape
        assert C == self.raw_channel
        heads = fused_conv1x1_pallas(x, self.w_fused, self.b_fused,
                                     self.head_offsets, self.out_channels)
        return [x] + heads


def _reference_f32(x, weights, biases):
    """Pure-JAX f32 reference (1x1 conv == einsum over channels)."""
    outs = [x]
    for w, b in zip(weights, biases):            # w: (c_out, c_in)
        y = jnp.einsum("oc,nchw->nohw", w, x,
                       precision=jax.lax.Precision.HIGHEST)
        outs.append(y + b[None, :, None, None])
    return outs


def _reference_bf16(x, weights, biases):
    """Reference with bf16-quantized inputs (mirrors the kernel's MXU path)."""
    outs = [x]
    xq = x.astype(jnp.bfloat16).astype(jnp.float32)
    for w, b in zip(weights, biases):
        wq = w.astype(jnp.bfloat16).astype(jnp.float32)
        y = jnp.einsum("oc,nchw->nohw", wq, xq,
                       precision=jax.lax.Precision.HIGHEST)
        outs.append(y + b[None, :, None, None])
    return outs


if __name__ == "__main__":
    key = jax.random.PRNGKey(0)
    k_x, k_params = jax.random.split(key)

    raw_channel = 4
    weave_add_channel = [8, 16]
    dense_num = 2
    block = WeaveBlockPallas(raw_channel, weave_add_channel, dense_num, k_params)

    test_shapes = [
        (2, 4, 16, 16),   # main path: 2 spatial tiles x 2 images
        (2, 4, 5, 5),     # deep-extras path: hw < 128 -> batch folded into lanes
        (1, 4, 13, 13),   # ragged last spatial tile handled in-kernel (no jnp.pad)
    ]
    for idx, shape in enumerate(test_shapes):
        x = jax.random.normal(jax.random.fold_in(k_x, idx), shape, jnp.float32)
        outs = block(x)
        outs = [jax.block_until_ready(o) for o in outs]
        assert len(outs) == dense_num + 1

        refs_q = _reference_bf16(x, block.weights, block.biases)  # structural check
        refs_f = _reference_f32(x, block.weights, block.biases)   # true f32 reference
        for o, rq, rf in zip(outs, refs_q, refs_f):
            assert o.shape == rq.shape, (o.shape, rq.shape)
            # Tight check vs. bf16-quantized reference (kernel multiplies in
            # bf16 and accumulates in f32).
            assert jnp.allclose(o, rq, atol=1e-3, rtol=1e-3)
            # Loosened tolerance vs. the f32 reference: intentional bf16 tradeoff.
            assert jnp.allclose(o, rf, atol=8e-2, rtol=5e-2)

    print("KERNEL_OK")
</pallas_src>

<mosaic_0001>
module attributes {stable_mosaic.version = 11 : i64} {
  func.func @kernel(%arg0: i32, %arg1: i32, %arg2: memref<1x4x128xf32, #tpu.memory_space<vmem>>, %arg3: memref<24x4xbf16, #tpu.memory_space<vmem>>, %arg4: memref<24x1xf32, #tpu.memory_space<vmem>>, %arg5: memref<1x8x128xf32, #tpu.memory_space<vmem>>, %arg6: memref<1x16x128xf32, #tpu.memory_space<vmem>>) attributes {dimension_semantics = [#tpu.dimension_semantics<parallel>, #tpu.dimension_semantics<parallel>], iteration_bounds = array<i64: 2, 2>, scalar_prefetch = 0 : i64, scratch_operands = 0 : i64, tpu.core_type = #tpu.core_type<tc>, window_params = [{transform_indices = @transform_0, window_bounds = array<i64: 1, 4, 128>}, {pipeline_mode = #tpu.pipeline_mode<synchronous>, transform_indices = @transform_1, window_bounds = array<i64: 24, 4>}, {pipeline_mode = #tpu.pipeline_mode<synchronous>, transform_indices = @transform_2, window_bounds = array<i64: 24, 1>}, {transform_indices = @transform_3, window_bounds = array<i64: 1, 8, 128>}, {transform_indices = @transform_4, window_bounds = array<i64: 1, 16, 128>}]} {
    %c0 = arith.constant 0 : index
    %c0_0 = arith.constant 0 : index
    %c0_1 = arith.constant 0 : index
    %0 = vector.load %arg2[%c0, %c0_0, %c0_1] : memref<1x4x128xf32, #tpu.memory_space<vmem>>, vector<1x4x128xf32>
    %1 = vector.shape_cast %0 : vector<1x4x128xf32> to vector<4x128xf32>
    %2 = arith.truncf %1 : vector<4x128xf32> to vector<4x128xbf16>
    %c0_2 = arith.constant 0 : index
    %c0_3 = arith.constant 0 : index
    %3 = vector.load %arg3[%c0_2, %c0_3] : memref<24x4xbf16, #tpu.memory_space<vmem>>, vector<24x4xbf16>
    %cst = arith.constant dense<0.000000e+00> : vector<24x128xf32>
    %4 = tpu.matmul %3, %2, %cst {dimension_numbers = #tpu.dot_dimension_numbers<[1], [0], [0], [1], [0, 0, 1, 1], [], []>} : vector<24x4xbf16>, vector<4x128xbf16>, vector<24x128xf32> -> vector<24x128xf32>
    %c0_4 = arith.constant 0 : index
    %c0_5 = arith.constant 0 : index
    %5 = vector.load %arg4[%c0_4, %c0_5] : memref<24x1xf32, #tpu.memory_space<vmem>>, vector<24x1xf32>
    %6 = vector.broadcast %5 : vector<24x1xf32> to vector<24x128xf32>
    %7 = arith.addf %4, %6 : vector<24x128xf32>
    %8 = vector.extract_strided_slice %7 {offsets = [0, 0], sizes = [8, 128], strides = [1, 1]} : vector<24x128xf32> to vector<8x128xf32>
    %c0_6 = arith.constant 0 : index
    %c0_7 = arith.constant 0 : index
    %c0_8 = arith.constant 0 : index
    %9 = vector.load %arg5[%c0_6, %c0_7, %c0_8] : memref<1x8x128xf32, #tpu.memory_space<vmem>>, vector<1x8x128xf32>
    %10 = vector.shape_cast %9 : vector<1x8x128xf32> to vector<8x128xf32>
    %11 = vector.shape_cast %8 : vector<8x128xf32> to vector<1x8x128xf32>
    tpu.vector_store %arg5[%c0_6, %c0_7, %c0_8], %11 {strides = array<i32>} : memref<1x8x128xf32, #tpu.memory_space<vmem>>, vector<1x8x128xf32>,
    %12 = vector.extract_strided_slice %7 {offsets = [8, 0], sizes = [16, 128], strides = [1, 1]} : vector<24x128xf32> to vector<16x128xf32>
    %c0_9 = arith.constant 0 : index
    %c0_10 = arith.constant 0 : index
    %c0_11 = arith.constant 0 : index
    %13 = vector.load %arg6[%c0_9, %c0_10, %c0_11] : memref<1x16x128xf32, #tpu.memory_space<vmem>>, vector<1x16x128xf32>
    %14 = vector.shape_cast %13 : vector<1x16x128xf32> to vector<16x128xf32>
    %15 = vector.shape_cast %12 : vector<16x128xf32> to vector<1x16x128xf32>
    tpu.vector_store %arg6[%c0_9, %c0_10, %c0_11], %15 {strides = array<i32>} : memref<1x16x128xf32, #tpu.memory_space<vmem>>, vector<1x16x128xf32>,
    return
  }
  func.func @transform_0(%arg0: i32, %arg1: i32) -> (i32, i32, i32) {
    %c0_i32 = arith.constant 0 : i32
    %c0_i32_0 = arith.constant 0 : i32
    return %arg1, %c0_i32, %arg0 : i32, i32, i32
  }
  func.func @transform_1(%arg0: i32, %arg1: i32) -> (i32, i32) {
    %c0_i32 = arith.constant 0 : i32
    %c0_i32_0 = arith.constant 0 : i32
    %c0_i32_1 = arith.constant 0 : i32
    return %c0_i32, %c0_i32_0 : i32, i32
  }
  func.func @transform_2(%arg0: i32, %arg1: i32) -> (i32, i32) {
    %c0_i32 = arith.constant 0 : i32
    %c0_i32_0 = arith.constant 0 : i32
    %c0_i32_1 = arith.constant 0 : i32
    return %c0_i32, %c0_i32_0 : i32, i32
  }
  func.func @transform_3(%arg0: i32, %arg1: i32) -> (i32, i32, i32) {
    %c0_i32 = arith.constant 0 : i32
    %c0_i32_0 = arith.constant 0 : i32
    return %arg1, %c0_i32, %arg0 : i32, i32, i32
  }
  func.func @transform_4(%arg0: i32, %arg1: i32) -> (i32, i32, i32) {
    %c0_i32 = arith.constant 0 : i32
    %c0_i32_0 = arith.constant 0 : i32
    return %arg1, %c0_i32, %arg0 : i32, i32, i32
  }
}

</mosaic_0001>

<bundles_post_ra>
// kernel: tpu_custom_call.1
= control target key start
LH: loop header
LB: loop body
LE: loop exit
PB: predicated region body
PF: predicated region fallthrough
CT: control target
= control target key end

     0   :  { %s943_s0 = inlined_call_operand.vmem [shape: f32[2,4,256], index: 0, kind: input, shape index: {}]   ;;  %s944_s1 = inlined_call_operand.vmem [shape: bf16[24,4], index: 1, kind: input, shape index: {}]   ;;  %s945_s2 = inlined_call_operand.vmem [shape: f32[24,1], index: 2, kind: input, shape index: {}]   ;;  %s946_s3 = inlined_call_operand.hbm [shape: f32[2,8,256], index: 3, kind: output, shape index: {0}]   ;;  %s947_s4 = inlined_call_operand.hbm [shape: f32[2,16,256], index: 4, kind: output, shape index: {1}]  }
   0x1   :  { %948 = sst [smem:[#allocation8_spill]] %s943_s0 }
   0x2   :  { %10 = vsyncpa [#allocation3], 0 }
   0x3   :  { %12 = vsyncpa [#allocation3 + $0x1], 0 }
   0x4   :  { %13 = vsyncpa [#allocation5], 0 }
   0x5   :  { %15 = vsyncpa [#allocation5 + $0x1], 0  ;;  %s748_s15 = smov 0   ;;  %s750_s16 = smov 0  }
   0x6   :  { %s752_s17 = smov 0   ;;  %s754_s18 = smov 0  }
   0x7   :  { %s756_s19 = smov 0   ;;  %s758_s20 = smov 0  }
   0x8   :  { %s760_s21 = smov 0   ;;  %s762_s22 = smov 0  }
   0x9 LB: > { %s478_s23 = sadd.s32 4294967295, %s715_s22   ;;  %s479_s24 = sadd.s32 4294967294, %s715_s22   ;;  %s715_s22 = sphi %s762_s22, %s21_s22   ;;  %s711_s21 = sphi %s760_s21, %s958_s21   ;;  %s707_s20 = sphi %s758_s20, %s957_s20   ;;  %s703_s19 = sphi %s756_s19, %s956_s19   ;;  %s699_s18 = sphi %s754_s18, %s955_s18   ;;  %s695_s17 = sphi %s752_s17, %s954_s17   ;;  %s691_s16 = sphi %s750_s16, %s953_s16   ;;  %s687_s15 = sphi %s748_s15, %s952_s15  }
   0xa   : > { %s30_s25 = sadd.s32 1, %s707_s20  ;;  %s33_s26 = sadd.s32 1, %s711_s21 }
   0xb   : > { %p31_p0 = scmp.ge.s32.totalorder %s30_s25, 2  ;;  %p122_p1 = scmp.ne.s32.totalorder %s695_s17, %s691_s16 }
   0xc   : > { %p123_p2 = scmp.eq.s32.totalorder %s478_s23, 3  ;;  %p128_p5 = scmp.ne.s32.totalorder %s691_s16, %s687_s15 }
   0xd   : > { %s960_s25 = smov (%p31_p0, %s30_s25), 0  ;;  %s962_s26 = smov (!%p31_p0, %s33_s26), %s711_s21 }
   0xe   : > { %s107_s27 = ssub.s32 %s707_s20, %s960_s25  ;;  %p799_p3 = por %p123_p2, %p122_p1 }
   0xf   : > { %p35_p4 = scmp.ge.s32.totalorder %s962_s26, 2  ;;  %p129_p6 = scmp.eq.s32.totalorder %s479_s24, 3 }
  0x10   : > { %p482_p7 = scmp.ge.s32.totalorder %s715_s22, 1  ;;  %p192_p9 = scmp.lt.s32.totalorder %s715_s22, 5 }
  0x11   : > { %s964_s26 = smov (%p35_p4, %s962_s26), 0  ;;  %p808_p8 = por %p129_p6, %p128_p5 }
  0x12   : > { %s108_s30 = ssub.s32 %s711_s21, %s964_s26  ;;  %s112_s5 = sadd.s32 1, %s695_s17 }
  0x13   : > { %s109_s6 = sor.u32 %s108_s30, %s107_s27  ;;  %p193_p10 = pnand %p482_p7, %p192_p9 }
  0x14   : > { %p110_p11 = scmp.eq.s32.totalorder %s109_s6, 0  ;;  %p226_p12 = scmp.lt.s32.totalorder (!%p193_p10), %s699_s18, 1 }
  0x15   : > { %196 = sbr.rel (%p193_p10) target bundleno = 274 (0x112), region = 32  ;;  %p228_p13 = scmp.lt.s32.totalorder (!%p193_p10), %s703_s19, 1 }
  0x16   : > { %s817_s7 = scalar_select %p110_p11, %s695_s17, %s112_s5  }
  0x17   : > { %s951_s0 = sld [smem:[#allocation8_spill]] (!%p193_p10)  ;;  %s844_s13 = sand.u32 (!%p193_p10), 1, %s691_s16  }
  0x18   : > { %s493_s14 = sshll.u32 (!%p193_p10), %s699_s18, 1  ;;  %s495_s27 = sshll.u32 (!%p193_p10), %s699_s18, 2 }
  0x19   : > { %s345_s30 = sadd.s32 (!%p193_p10), %s703_s19, %s493_s14 }
  0x1a   : > { %v591_v0 = vld [vmem:[%s944_s1] sm:$0xff]   ;;  %vm266_vm0 = vcmask 31744   ;;  %s227_s10 = scalar_select %p226_p12, %s699_s18, 1  ;;  %v717_v1 = vmov 0   ;;  %v242_v3 = vld [vmem:[%s945_s2 + $0x10] sm:$0xff]  ;;  %v241_v4 = vld [vmem:[%s945_s2 + $0x8] sm:$0xff] }
  0x1b   : > { %504 = vmatprep.mubr.msk.bf16.mxu0 %vm266_vm0, %v591_v0  ;;  %589 = vset.pattern.permute.xlu0 %v717_v1  ;;  %v240_v2 = vld [vmem:[%s945_s2] sm:$0xff]  ;;  %s229_s23 = scalar_select %p228_p13, %s703_s19, 1  ;;  %vm273_vm1 = vcmask 1041408   ;;  %v592_v8 = vld [vmem:[%s944_s1 + $0x8] ss:$0 sps:$4 sm:$0xff]  }
  0x1c   : > { %245 = vperm.xlu0 %589, %v240_v2   ;;  %590 = vset.pattern.permute.xlu1 %v717_v1  ;;  %s485_s24 = sshll.u32 %s227_s10, 1 }
  0x1d   : > { %255 = vperm.xlu1 %590, %v242_v3   ;;  %s231_s5 = sadd.s32 %s485_s24, %s229_s23  ;;  %s484_s23 = sshll.u32 %s844_s13, 4 }
  0x1e   : > { %s486_s6 = sshll.u32 %s231_s5, 2  ;;  %s483_s24 = sshll.u32 %s844_s13, 3 }
  0x1f   : > { %s233_s11 = scalar_lea.vmem %s951_s0, %s486_s6  ;;  %s360_s5 = sadd.s32 %s703_s19, %s495_s27 }
  0x20   : > { %250 = vperm.xlu0 %589, %v241_v4   ;;  %v235_v5 = vld [vmem:[%s233_s11] sm:$0xf]  ;;  %s494_s6 = sshll.u32 %s345_s30, 7  ;;  %s218_s8 = scalar_lea.vmem [#allocation2], %s483_s24 }
  0x21   : > { %v236_v6 = vpack.c.bf16 %v235_v5, %v235_v5  ;;  %s349_s9 = sshll.u32 %s218_s8, 4  ;;  %s852_s11 = scalar_lea.vmem [#allocation4], %s484_s23  ;;  %s861_s9 = int_to_ptr.vmem [resolvable:$true] %s349_s9 }
  0x22   : > { %s363_s10 = sshll.u32 %s852_s11, 4  ;;  %s496_s12 = sshll.u32 %s360_s5, 7  ;;  %s863_s10 = int_to_ptr.vmem [resolvable:$true] %s363_s10 }
  0x23   : > { %508 = vmatprep.subr.msk.bf16.mxu0 %vm273_vm1, %v236_v6  ;;  %v275_v7 = vsel %vm273_vm1, %v236_v6, 0  ;;  %s859_s19 = scalar_lea.hbm %s946_s3, %s494_s6  ;;  %s868_s27 = scalar_lea.hbm %s947_s4, %s496_s12 }
  0x24   : > { %503 = vmatpush3.bf16.msra.mxu0 %v275_v7  ;;  %s329_s30 = scalar_lea.sflag [#allocation3], %s844_s13  ;;  %s593_s5 = scalar_lea.vmem %s861_s9, 128 }
  0x25   : > { %p594_p0 = scmp.ne.s32.totalorder %s861_s9, %s593_s5  ;;  %s718_s6 = smov [#allocation2]  }
  0x26   : > { %s597_s18 = sshll.u32 %s718_s6, 4  ;;  %s598_s18 = int_to_ptr.vmem [resolvable:$false] %s597_s18 }
  0x27   : > { %505 = vmatmul.mubr.msk.bf16.vlgmr.msra.gmra.mxu0 %vm266_vm0, %v592_v8  ;;  %p595_p1 = pnand %p594_p0, %p799_p3  ;;  %s599_s14 = scalar_lea.vmem %s598_s18, 256 }
  0x28   : > { %p600_p4 = scmp.lt.s32.totalorder %s861_s9, %s598_s18  ;;  %p601_p5 = scmp.lt.s32.totalorder %s599_s14, %s593_s5 }
  0x29   : > { %p596_p2 = pneg %p595_p1 }
  0x2a   : > { %p602_p6 = por %p601_p5, %p600_p4 }
  0x2c   : > { %p603_p7 = pnand %p602_p6, %p596_p2 }
  0x97   : > { %v246_v10 = vpop.permute.xlu0 %245 }
  0x98   : > { %v256_v9 = vpop.permute.xlu1 %255 }
  0x9b   : > { %v251_v16 = vpop.permute.xlu0 %250 }
  0xe7   : > { %v506_v11 = vpop.f32.mrf.mxu0 }
  0xe8   : > { %v320_v12 = vadd.f32 %v506_v11, %v256_v9 }
  0xe9   : > { %v311_v13 = vpop.f32.mrf.mxu0 }
  0xea   : > { %327 = vst [vmem:[%s852_s11 + $0x8] sm:$0xff] %v320_v12  ;;  %v312_v14 = vadd.f32 %v311_v13, %v246_v10 }
  0xeb   : > { %v507_v15 = vpop.f32.mrf.mxu0 }
  0xec   : > { %325 = vst [vmem:[%s218_s8] sm:$0xff] %v312_v14 }
  0xed   : > { %v314_v17 = vpop.f32.mrf.mxu0 }
  0xee   : > { %606 = shalt.err (!%p603_p7)
}
  0xef   : > { %s607_s8 = scalar_lea.hbm %s859_s19, 128  ;;  %s611_s24 = scalar_lea.hbm %s946_s3, 512 }
  0xf0   : > { %p608_p9 = scmp.ne.s32.totalorder %s859_s19, %s607_s8  ;;  %p612_p12 = scmp.lt.s32.totalorder %s859_s19, %s946_s3 }
  0xf1   : > { %p613_p13 = scmp.lt.s32.totalorder %s611_s24, %s607_s8 }
  0xf2   : > { %p609_p10 = pnand %p608_p9, %p799_p3 }
  0xf3   : > { %p614_p0 = por %p613_p13, %p612_p12 }
  0xf4   : > { %p610_p11 = pneg %p609_p10 }
  0xf6   : > { %p615_p1 = pnand %p614_p0, %p610_p11 }
  0xf8   : > { %618 = shalt.err (!%p615_p1)
}
  0xf9   : > { %509 = dma.vmem_to_hbm [thread:$0]  (%p799_p3), %s861_s9, 128, %s859_s19, %s329_s30   ;;  %v315_v18 = vadd.f32 %v314_v17, %v251_v16 }
  0xfa   : > { %s334_s5 = scalar_lea.sflag [#allocation5], %s844_s13  ;;  %s619_s0 = scalar_lea.vmem %s863_s10, 256 }
  0xfb   : > { %326 = vst [vmem:[%s852_s11] sm:$0xff] %v315_v18  ;;  %p620_p2 = scmp.ne.s32.totalorder %s863_s10, %s619_s0  ;;  %s719_s18 = smov [#allocation4]  }
  0xfc   : > { %s623_s14 = sshll.u32 %s719_s18, 4  ;;  %s624_s14 = int_to_ptr.vmem [resolvable:$false] %s623_s14 }
  0xfd   : > { %p621_p4 = pnand %p620_p2, %p799_p3  ;;  %s625_s8 = scalar_lea.vmem %s624_s14, 512 }
  0xfe   : > { %p626_p6 = scmp.lt.s32.totalorder %s863_s10, %s624_s14  ;;  %p627_p7 = scmp.lt.s32.totalorder %s625_s8, %s619_s0 }
  0xff   : > { %p622_p5 = pneg %p621_p4 }
 0x100   : > { %p628_p9 = por %p627_p7, %p626_p6 }
 0x102   : > { %p629_p10 = pnand %p628_p9, %p622_p5 }
 0x104   : > { %632 = shalt.err (!%p629_p10)
}
 0x105   : > { %s633_s9 = scalar_lea.hbm %s868_s27, 256  ;;  %s637_s30 = scalar_lea.hbm %s947_s4, 1024 }
 0x106   : > { %p634_p11 = scmp.ne.s32.totalorder %s868_s27, %s633_s9  ;;  %p638_p0 = scmp.lt.s32.totalorder %s868_s27, %s947_s4 }
 0x107   : > { %p639_p1 = scmp.lt.s32.totalorder %s637_s30, %s633_s9 }
 0x108   : > { %p635_p12 = pnand %p634_p11, %p799_p3 }
 0x109   : > { %p640_p2 = por %p639_p1, %p638_p0 }
 0x10a   : > { %p636_p13 = pneg %p635_p12 }
 0x10c   : > { %p641_p4 = pnand %p640_p2, %p636_p13 }
 0x10e   : > { %644 = shalt.err (!%p641_p4)
}
 0x10f   : > { %s720_s24 = smov 128   ;;  %s721_s6 = smov 256  }
 0x110   : > { %s722_s0 = smov 8  }
 0x111   : > { %510 = dma.vmem_to_hbm [thread:$0]  (%p799_p3), %s863_s10, 256, %s868_s27, %s334_s5, %s720_s24, %s721_s6, %s722_s0  }
 0x112 PF: > { %p520_p5 = scmp.ge.s32.totalorder %s715_s22, 2  ;;  %s378_s18 = sand.u32 1, %s687_s15  }
 0x113   : > { %s379_s14 = scalar_lea.sflag [#allocation3], %s378_s18 }
 0x114   : > { %p514_p6 = pnand %p520_p5, %p808_p8 }
 0x116   : > { %p515_p7 = pneg %p514_p6 }
 0x118   : > { %678 = dma.done.wait (%p515_p7), %s379_s14, 128  }
 0x119   : > { %680 = vsyncadd (%p515_p7), %s379_s14, 4294967168  ;;  %s388_s8 = scalar_lea.sflag [#allocation5], %s378_s18 }
 0x11a   : > { %682 = dma.done.wait (%p515_p7), %s388_s8, 256  }
 0x11b   : > { %684 = vsyncadd (%p515_p7), %s388_s8, 4294967040  ;;  %s21_s22 = sadd.s32 1, %s715_s22   ;;  %s952_s15 = smov %s691_s16 }
 0x11c   : > { %p18_p9 = scmp.ge.s32.totalorder %s21_s22, 6   ;;  %s953_s16 = smov %s695_s17 }
 0x11d   : > { %s954_s17 = smov %s817_s7  ;;  %s955_s18 = smov %s707_s20 }
 0x11e   : > { %s956_s19 = smov %s711_s21  ;;  %s957_s20 = smov %s960_s25 }
 0x11f   : > { %s958_s21 = smov %s964_s26  ;;  %20 = sbr.rel (!%p18_p9) target bundleno = 9 (0x9), region = 84 }
 0x124   :  { %393 = vsyncpa [#allocation3], 1 }
 0x125   :  { %395 = vsyncpa [#allocation3 + $0x1], 1 }
 0x126   :  { %396 = vsyncpa [#allocation5], 1 }
 0x127   :  { %398 = vsyncpa [#allocation5 + $0x1], 1 }

</bundles_post_ra>
